<compile_context>
chip_gen: v7x
topology: tpu7x:2x2x1
jax: 0.10.0
libtpu: 0.0.40
codegen_flags: <defaults>
</compile_context>

<pallas_src>
import functools

import jax
import jax.numpy as jnp
import numpy as np
from jax.experimental import pallas as pl


# --------------------------------------------------------------------------
# Fused kernel: ConvTranspose1d -> BatchNorm1d -> Identity, whole batch in VMEM.
#
# For stride=2, K=3, pad=1 the transposed conv decomposes into two phases:
#   even[:, i] = W1^T @ x[:, i]                      (L columns per batch elem)
#   odd[:, i]  = W2^T @ x[:, i] + W0^T @ x[:, i+1]   (L-1 columns per batch elem)
# With xx = [x; x_shifted_left_by_1] (2*cin, N*L) and
#      W_big = [[W1^T, 0], [W2^T, W0^T]] (2*cout, 2*cin),
# a single W_big @ xx produces both phase slabs for the whole batch at once.
# --------------------------------------------------------------------------
def upsample_kernel(xx_ref, w_ref, gb_ref, o_ref, *, eps, n_batch, length, use_mxu):
    """xx_ref: (2*cin, N*L) batch-major columns (x stacked over x-shift);
    w_ref: (2*cout, 2*cin) phase matrix; gb_ref: (cout, 2) = [gamma, beta];
    o_ref: (2, cout, N*L) -- [0]=even phase, [1]=odd phase (per-batch lane L-1 = pad)."""
    cin2, NL = xx_ref.shape
    cout = gb_ref.shape[0]
    L = length

    w = w_ref[...]                                   # (2*cout, 2*cin)
    xx = xx_ref[...]                                 # (2*cin, N*L)

    if use_mxu:
        # One batched MXU push for the whole batch.
        r = jnp.dot(w, xx, preferred_element_type=jnp.float32)       # (2*cout, N*L)
    else:
        # Contraction depth 2*cin = 8: skip the MXU entirely -> 8 VPU
        # broadcast-FMAs on a single (2*cout, N*L) tile (VALU slots absorb it).
        r = w[:, 0:1] * xx[0:1, :]
        for ci in range(1, cin2):                    # static unroll (tiny)
            r = r + w[:, ci:ci + 1] * xx[ci:ci + 1, :]

    even = r[:cout, :]                               # output positions 2i
    odd = r[cout:, :]                                # output positions 2i+1

    # Mask each batch element's odd pad lane (in-batch column L-1): it is not a
    # real output position, must not enter the BN statistics, and absorbs the
    # wrap-around column of the wrapper-side shifted x copy.
    col = jax.lax.broadcasted_iota(jnp.int32, (cout, NL), 1)
    if (L & (L - 1)) == 0:
        in_batch = col & (L - 1)                     # L is a power of two
    else:
        in_batch = col % L
    odd = jnp.where(in_batch != L - 1, odd, 0.0)

    # BatchNorm1d training mode: biased per-channel stats over N*(2L-1) positions.
    # One-pass E[x^2]-E[x]^2 (clamped at 0); fine at rtol 1e-4 for these activations.
    count = float(n_batch * (2 * L - 1))
    total = even.sum(axis=1, keepdims=True) + odd.sum(axis=1, keepdims=True)       # (cout,1)
    totsq = (even * even).sum(axis=1, keepdims=True) + (odd * odd).sum(axis=1, keepdims=True)
    mean = total / count
    var = jnp.maximum(totsq / count - mean * mean, 0.0)
    scale = gb_ref[:, 0:1] * jax.lax.rsqrt(var + eps)   # folded affine (EUP rsqrt)
    shift = gb_ref[:, 1:2] - mean * scale

    # Two full-lane-width stores; pad lanes carry `shift` and are sliced off by
    # the wrapper, so nothing un-normalized leaks into the returned output.
    o_ref[0] = even * scale + shift
    o_ref[1] = odd * scale + shift


# --------------------------------------------------------------------------
# One-time parameter prep (hoisted out of the forward pass).
# --------------------------------------------------------------------------
def prepare_upsample_params(w, gamma, beta):
    """w: (cin, cout, K=3) PyTorch ConvTranspose1d layout.

    Returns:
      w_big: (2*cout, 2*cin) phase matrix [[W1^T, 0], [W2^T, W0^T]] such that
             [even; odd] = w_big @ [x; x_shifted_left_by_1].
      gb:    (cout, 2) packed [gamma, beta] (single parameter DMA).
    """
    cin, cout, K = w.shape
    assert K == 3
    wT = jnp.transpose(w, (2, 1, 0))                         # (K, cout, cin); wT[k] = Wk^T
    zeros = jnp.zeros((cout, cin), w.dtype)
    even_rows = jnp.concatenate([wT[1], zeros], axis=1)      # (cout, 2*cin)
    odd_rows = jnp.concatenate([wT[2], wT[0]], axis=1)       # (cout, 2*cin)
    w_big = jnp.concatenate([even_rows, odd_rows], axis=0)   # (2*cout, 2*cin)
    gb = jnp.stack([gamma, beta], axis=1)                    # (cout, 2)
    return w_big, gb


# --------------------------------------------------------------------------
# Forward: single pallas_call + pure layout glue on either side.
# --------------------------------------------------------------------------
def upsample_forward(x, w_big, gb, eps=1e-5, use_mxu=False):
    N, cin, L = x.shape
    cout = gb.shape[0]

    # Layout glue only: (N, cin, L) -> (cin, N*L) batch-major columns, plus the
    # left-shifted copy the odd phase needs, packed into ONE (2*cin, N*L) input.
    x2d = jnp.transpose(x, (1, 0, 2)).reshape(cin, N * L)
    x_shift = jnp.roll(x2d, shift=-1, axis=1)       # wrap lands only in masked pad lanes
    xx = jnp.concatenate([x2d, x_shift], axis=0)    # (2*cin, N*L)

    out = pl.pallas_call(
        functools.partial(upsample_kernel, eps=eps, n_batch=N, length=L, use_mxu=use_mxu),
        out_shape=jax.ShapeDtypeStruct((2, cout, N * L), jnp.float32),
    )(xx, w_big, gb)

    # Layout glue only: interleave even/odd phases -> (N, cout, 2L-1). No compute.
    y = out.reshape(2, cout, N, L)                  # (phase, cout, n, i)
    y = jnp.transpose(y, (2, 1, 3, 0)).reshape(N, cout, 2 * L)
    return y[:, :, : 2 * L - 1]


# --------------------------------------------------------------------------
# Pure-numpy reference (PyTorch semantics) for verification.
# --------------------------------------------------------------------------
def reference(x, w, gamma, beta, stride=2, padding=1, eps=1e-5):
    x, w = np.asarray(x), np.asarray(w)
    N, cin, L = x.shape
    _, cout, K = w.shape
    Lout = (L - 1) * stride - 2 * padding + K
    out = np.zeros((N, cout, Lout), np.float32)
    for n in range(N):
        for ci in range(cin):
            for i in range(L):
                for k in range(K):
                    t = i * stride - padding + k
                    if 0 <= t < Lout:
                        out[n, :, t] += x[n, ci, i] * w[ci, :, k]
    mean = out.mean(axis=(0, 2), keepdims=True)
    var = ((out - mean) ** 2).mean(axis=(0, 2), keepdims=True)
    out = (out - mean) / np.sqrt(var + eps)
    out = out * np.asarray(gamma).reshape(1, cout, 1) + np.asarray(beta).reshape(1, cout, 1)
    return out


if __name__ == "__main__":
    N, cin, cout, L, K = 2, 4, 8, 16, 3

    key = jax.random.PRNGKey(0)
    kx, kw = jax.random.split(key)
    x = jax.random.normal(kx, (N, cin, L), jnp.float32)
    # ConvTranspose1d weight (PyTorch layout: (cin, cout, K)); deterministic init.
    w = jax.random.normal(kw, (cin, cout, K), jnp.float32) * 0.1
    gamma = jnp.ones((cout,), jnp.float32)   # BatchNorm1d default weight
    beta = jnp.zeros((cout,), jnp.float32)   # BatchNorm1d default bias

    w_big, gb = prepare_upsample_params(w, gamma, beta)
    ref = reference(x, w, gamma, beta)

    fwd = jax.jit(upsample_forward, static_argnames=("use_mxu",))

    # Default path: 8 VPU broadcast-FMAs (MXU skipped for this K=8 contraction).
    out_vpu = jax.block_until_ready(fwd(x, w_big, gb))
    assert out_vpu.shape == (N, cout, 2 * L - 1), out_vpu.shape
    np.testing.assert_allclose(np.asarray(out_vpu), ref, rtol=1e-4, atol=1e-4)

    # MXU path kept behind a flag (benchmark both per generation).
    out_mxu = jax.block_until_ready(fwd(x, w_big, gb, use_mxu=True))
    np.testing.assert_allclose(np.asarray(out_mxu), ref, rtol=1e-4, atol=1e-4)

    # TODO(synk): BatchNorm1d running_mean/running_var buffer updates (training
    # side effect) are not emitted; they do not affect the forward output.
    print("KERNEL_OK")
</pallas_src>

<mosaic_0001>
module attributes {stable_mosaic.version = 11 : i64} {
  func.func @upsample_kernel(%arg0: memref<8x32xf32, #tpu.memory_space<vmem>>, %arg1: memref<16x8xf32, #tpu.memory_space<vmem>>, %arg2: memref<8x2xf32, #tpu.memory_space<vmem>>, %arg3: memref<2x8x32xf32, #tpu.memory_space<vmem>>) attributes {dimension_semantics = [], scalar_prefetch = 0 : i64, scratch_operands = 0 : i64, tpu.core_type = #tpu.core_type<tc>} {
    %c0 = arith.constant 0 : index
    %c0_0 = arith.constant 0 : index
    %0 = vector.load %arg1[%c0, %c0_0] : memref<16x8xf32, #tpu.memory_space<vmem>>, vector<16x8xf32>
    %c0_1 = arith.constant 0 : index
    %c0_2 = arith.constant 0 : index
    %1 = vector.load %arg0[%c0_1, %c0_2] : memref<8x32xf32, #tpu.memory_space<vmem>>, vector<8x32xf32>
    %2 = vector.extract_strided_slice %0 {offsets = [0, 0], sizes = [16, 1], strides = [1, 1]} : vector<16x8xf32> to vector<16x1xf32>
    %3 = vector.extract_strided_slice %1 {offsets = [0, 0], sizes = [1, 32], strides = [1, 1]} : vector<8x32xf32> to vector<1x32xf32>
    %4 = vector.broadcast %2 : vector<16x1xf32> to vector<16x32xf32>
    %5 = vector.broadcast %3 : vector<1x32xf32> to vector<16x32xf32>
    %6 = arith.mulf %4, %5 : vector<16x32xf32>
    %7 = vector.extract_strided_slice %0 {offsets = [0, 1], sizes = [16, 1], strides = [1, 1]} : vector<16x8xf32> to vector<16x1xf32>
    %8 = vector.extract_strided_slice %1 {offsets = [1, 0], sizes = [1, 32], strides = [1, 1]} : vector<8x32xf32> to vector<1x32xf32>
    %9 = vector.broadcast %7 : vector<16x1xf32> to vector<16x32xf32>
    %10 = vector.broadcast %8 : vector<1x32xf32> to vector<16x32xf32>
    %11 = arith.mulf %9, %10 : vector<16x32xf32>
    %12 = arith.addf %6, %11 : vector<16x32xf32>
    %13 = vector.extract_strided_slice %0 {offsets = [0, 2], sizes = [16, 1], strides = [1, 1]} : vector<16x8xf32> to vector<16x1xf32>
    %14 = vector.extract_strided_slice %1 {offsets = [2, 0], sizes = [1, 32], strides = [1, 1]} : vector<8x32xf32> to vector<1x32xf32>
    %15 = vector.broadcast %13 : vector<16x1xf32> to vector<16x32xf32>
    %16 = vector.broadcast %14 : vector<1x32xf32> to vector<16x32xf32>
    %17 = arith.mulf %15, %16 : vector<16x32xf32>
    %18 = arith.addf %12, %17 : vector<16x32xf32>
    %19 = vector.extract_strided_slice %0 {offsets = [0, 3], sizes = [16, 1], strides = [1, 1]} : vector<16x8xf32> to vector<16x1xf32>
    %20 = vector.extract_strided_slice %1 {offsets = [3, 0], sizes = [1, 32], strides = [1, 1]} : vector<8x32xf32> to vector<1x32xf32>
    %21 = vector.broadcast %19 : vector<16x1xf32> to vector<16x32xf32>
    %22 = vector.broadcast %20 : vector<1x32xf32> to vector<16x32xf32>
    %23 = arith.mulf %21, %22 : vector<16x32xf32>
    %24 = arith.addf %18, %23 : vector<16x32xf32>
    %25 = vector.extract_strided_slice %0 {offsets = [0, 4], sizes = [16, 1], strides = [1, 1]} : vector<16x8xf32> to vector<16x1xf32>
    %26 = vector.extract_strided_slice %1 {offsets = [4, 0], sizes = [1, 32], strides = [1, 1]} : vector<8x32xf32> to vector<1x32xf32>
    %27 = vector.broadcast %25 : vector<16x1xf32> to vector<16x32xf32>
    %28 = vector.broadcast %26 : vector<1x32xf32> to vector<16x32xf32>
    %29 = arith.mulf %27, %28 : vector<16x32xf32>
    %30 = arith.addf %24, %29 : vector<16x32xf32>
    %31 = vector.extract_strided_slice %0 {offsets = [0, 5], sizes = [16, 1], strides = [1, 1]} : vector<16x8xf32> to vector<16x1xf32>
    %32 = vector.extract_strided_slice %1 {offsets = [5, 0], sizes = [1, 32], strides = [1, 1]} : vector<8x32xf32> to vector<1x32xf32>
    %33 = vector.broadcast %31 : vector<16x1xf32> to vector<16x32xf32>
    %34 = vector.broadcast %32 : vector<1x32xf32> to vector<16x32xf32>
    %35 = arith.mulf %33, %34 : vector<16x32xf32>
    %36 = arith.addf %30, %35 : vector<16x32xf32>
    %37 = vector.extract_strided_slice %0 {offsets = [0, 6], sizes = [16, 1], strides = [1, 1]} : vector<16x8xf32> to vector<16x1xf32>
    %38 = vector.extract_strided_slice %1 {offsets = [6, 0], sizes = [1, 32], strides = [1, 1]} : vector<8x32xf32> to vector<1x32xf32>
    %39 = vector.broadcast %37 : vector<16x1xf32> to vector<16x32xf32>
    %40 = vector.broadcast %38 : vector<1x32xf32> to vector<16x32xf32>
    %41 = arith.mulf %39, %40 : vector<16x32xf32>
    %42 = arith.addf %36, %41 : vector<16x32xf32>
    %43 = vector.extract_strided_slice %0 {offsets = [0, 7], sizes = [16, 1], strides = [1, 1]} : vector<16x8xf32> to vector<16x1xf32>
    %44 = vector.extract_strided_slice %1 {offsets = [7, 0], sizes = [1, 32], strides = [1, 1]} : vector<8x32xf32> to vector<1x32xf32>
    %45 = vector.broadcast %43 : vector<16x1xf32> to vector<16x32xf32>
    %46 = vector.broadcast %44 : vector<1x32xf32> to vector<16x32xf32>
    %47 = arith.mulf %45, %46 : vector<16x32xf32>
    %48 = arith.addf %42, %47 : vector<16x32xf32>
    %49 = vector.extract_strided_slice %48 {offsets = [0, 0], sizes = [8, 32], strides = [1, 1]} : vector<16x32xf32> to vector<8x32xf32>
    %50 = vector.extract_strided_slice %48 {offsets = [8, 0], sizes = [8, 32], strides = [1, 1]} : vector<16x32xf32> to vector<8x32xf32>
    %51 = tpu.iota {dimensions = array<i32: 1>} : vector<8x32xi32>
    %c15_i32 = arith.constant 15 : i32
    %52 = vector.broadcast %c15_i32 : i32 to vector<8x32xi32>
    %53 = arith.andi %51, %52 : vector<8x32xi32>
    %c15_i32_3 = arith.constant 15 : i32
    %54 = vector.broadcast %c15_i32_3 : i32 to vector<8x32xi32>
    %55 = arith.cmpi ne, %53, %54 : vector<8x32xi32>
    %cst = arith.constant 0.000000e+00 : f32
    %56 = vector.broadcast %cst : f32 to vector<8x32xf32>
    %57 = arith.select %55, %50, %56 : vector<8x32xi1>, vector<8x32xf32>
    %cst_4 = arith.constant dense<0.000000e+00> : vector<8xf32>
    %58 = vector.multi_reduction <add>, %49, %cst_4 [1] : vector<8x32xf32> to vector<8xf32>
    %59 = vector.shape_cast %58 : vector<8xf32> to vector<8x1xf32>
    %cst_5 = arith.constant dense<0.000000e+00> : vector<8xf32>
    %60 = vector.multi_reduction <add>, %57, %cst_5 [1] : vector<8x32xf32> to vector<8xf32>
    %61 = vector.shape_cast %60 : vector<8xf32> to vector<8x1xf32>
    %62 = arith.addf %59, %61 : vector<8x1xf32>
    %63 = arith.mulf %49, %49 : vector<8x32xf32>
    %cst_6 = arith.constant dense<0.000000e+00> : vector<8xf32>
    %64 = vector.multi_reduction <add>, %63, %cst_6 [1] : vector<8x32xf32> to vector<8xf32>
    %65 = vector.shape_cast %64 : vector<8xf32> to vector<8x1xf32>
    %66 = arith.mulf %57, %57 : vector<8x32xf32>
    %cst_7 = arith.constant dense<0.000000e+00> : vector<8xf32>
    %67 = vector.multi_reduction <add>, %66, %cst_7 [1] : vector<8x32xf32> to vector<8xf32>
    %68 = vector.shape_cast %67 : vector<8xf32> to vector<8x1xf32>
    %69 = arith.addf %65, %68 : vector<8x1xf32>
    %cst_8 = arith.constant 6.200000e+01 : f32
    %70 = vector.broadcast %cst_8 : f32 to vector<8x1xf32>
    %71 = arith.divf %62, %70 : vector<8x1xf32>
    %cst_9 = arith.constant 6.200000e+01 : f32
    %72 = vector.broadcast %cst_9 : f32 to vector<8x1xf32>
    %73 = arith.divf %69, %72 : vector<8x1xf32>
    %74 = arith.mulf %71, %71 : vector<8x1xf32>
    %75 = arith.subf %73, %74 : vector<8x1xf32>
    %cst_10 = arith.constant 0.000000e+00 : f32
    %76 = vector.broadcast %cst_10 : f32 to vector<8x1xf32>
    %77 = arith.maximumf %75, %76 : vector<8x1xf32>
    %c0_11 = arith.constant 0 : index
    %c0_12 = arith.constant 0 : index
    %78 = vector.load %arg2[%c0_11, %c0_12] : memref<8x2xf32, #tpu.memory_space<vmem>>, vector<8x1xf32>
    %cst_13 = arith.constant 9.99999974E-6 : f32
    %79 = vector.broadcast %cst_13 : f32 to vector<8x1xf32>
    %80 = arith.addf %77, %79 : vector<8x1xf32>
    %81 = math.rsqrt %80 : vector<8x1xf32>
    %82 = arith.mulf %78, %81 : vector<8x1xf32>
    %c0_14 = arith.constant 0 : index
    %c1 = arith.constant 1 : index
    %83 = vector.load %arg2[%c0_14, %c1] : memref<8x2xf32, #tpu.memory_space<vmem>>, vector<8x1xf32>
    %84 = arith.mulf %71, %82 : vector<8x1xf32>
    %85 = arith.subf %83, %84 : vector<8x1xf32>
    %86 = vector.broadcast %82 : vector<8x1xf32> to vector<8x32xf32>
    %87 = arith.mulf %49, %86 : vector<8x32xf32>
    %88 = vector.broadcast %85 : vector<8x1xf32> to vector<8x32xf32>
    %89 = arith.addf %87, %88 : vector<8x32xf32>
    %c0_15 = arith.constant 0 : index
    %c0_16 = arith.constant 0 : index
    %c0_17 = arith.constant 0 : index
    %90 = vector.load %arg3[%c0_15, %c0_16, %c0_17] : memref<2x8x32xf32, #tpu.memory_space<vmem>>, vector<1x8x32xf32>
    %91 = vector.shape_cast %90 : vector<1x8x32xf32> to vector<8x32xf32>
    %92 = vector.shape_cast %89 : vector<8x32xf32> to vector<1x8x32xf32>
    tpu.vector_store %arg3[%c0_15, %c0_16, %c0_17], %92 {strides = array<i32>} : memref<2x8x32xf32, #tpu.memory_space<vmem>>, vector<1x8x32xf32>,
    %93 = vector.broadcast %82 : vector<8x1xf32> to vector<8x32xf32>
    %94 = arith.mulf %57, %93 : vector<8x32xf32>
    %95 = vector.broadcast %85 : vector<8x1xf32> to vector<8x32xf32>
    %96 = arith.addf %94, %95 : vector<8x32xf32>
    %c1_18 = arith.constant 1 : index
    %c0_19 = arith.constant 0 : index
    %c0_20 = arith.constant 0 : index
    %97 = vector.load %arg3[%c1_18, %c0_19, %c0_20] : memref<2x8x32xf32, #tpu.memory_space<vmem>>, vector<1x8x32xf32>
    %98 = vector.shape_cast %97 : vector<1x8x32xf32> to vector<8x32xf32>
    %99 = vector.shape_cast %96 : vector<8x32xf32> to vector<1x8x32xf32>
    tpu.vector_store %arg3[%c1_18, %c0_19, %c0_20], %99 {strides = array<i32>} : memref<2x8x32xf32, #tpu.memory_space<vmem>>, vector<1x8x32xf32>,
    return
  }
}

</mosaic_0001>

<bundles_post_ra>
// kernel: upsample_forward.1
= control target key start
LH: loop header
LB: loop body
LE: loop exit
PB: predicated region body
PF: predicated region fallthrough
CT: control target
= control target key end

     0   :  { %v233_v0 = vmov 0   ;;  %v234_v3 = vmov 1   ;;  %v235_v4 = vmov 2   ;;  %v236_v5 = vmov 3   ;;  %s241_s18 = smov 1   ;;  %s290_s1 = inlined_call_operand.vmem [shape: f32[16,8], index: 1, kind: input, shape index: {}]   ;;  %s291_s0 = inlined_call_operand.vmem [shape: f32[8,32], index: 0, kind: input, shape index: {}]   ;;  %s292_s2 = inlined_call_operand.vmem [shape: f32[8,2], index: 2, kind: input, shape index: {}]   ;;  %s293_s3 = inlined_call_operand.vmem [shape: f32[2,8,32], index: 3, kind: output, shape index: {}]  }
   0x1   :  { %216 = vset.pattern.permute.xlu1 %v233_v0  ;;  %214 = vset.pattern.permute.xlu0 %v233_v0  ;;  %v15_v1 = vld [vmem:[%s290_s1 + $0x8] sm:$0xff]  ;;  %v14_v2 = vld [vmem:[%s290_s1] sm:$0xff]  ;;  %v237_v6 = vmov 4   ;;  %v238_v7 = vmov 5   ;;  %v239_v8 = vmov 7   ;;  %v240_v9 = vmov 6  }
   0x2   :  { %24 = vperm.xlu0 %214, %v15_v1   ;;  %19 = vperm.xlu1 %216, %v14_v2   ;;  %v27_v11 = vlaneseq  ;;  %v16_v18 = vld [vmem:[%s291_s0] sm:$0xff]  ;;  %vm150_vm1 = vcmask 261120  }
   0x4   :  { %v28_v14 = vshrl.u32 %v27_v11, 7  ;;  %v146_v50 = vand.u32 127, %v27_v11 }
   0x6   :  { %215 = vset.pattern.permute.xlu0 %v234_v3  ;;  %217 = vset.pattern.permute.xlu1 %v234_v3  ;;  %v29_v16 = vsub.s32 0, %v28_v14  ;;  %v43_v17 = vsub.s32 1, %v28_v14  ;;  %v59_v20 = vsub.s32 2, %v28_v14  ;;  %v75_v24 = vsub.s32 3, %v28_v14 }
   0x7   :  { %38 = vperm.xlu0 %215, %v15_v1   ;;  %34 = vperm.xlu1 %217, %v14_v2   ;;  %v91_v31 = vsub.s32 4, %v28_v14  ;;  %v107_v38 = vsub.s32 5, %v28_v14  ;;  %v123_v40 = vsub.s32 6, %v28_v14  ;;  %v139_v41 = vsub.s32 7, %v28_v14 }
   0x8   :  { %v30_v22 = vrot.slane %v16_v18, %v29_v16  ;;  %v44_v23 = vrot.slane %v16_v18, %v43_v17  ;;  %v60_v27 = vrot.slane %v16_v18, %v59_v20  ;;  %v76_v30 = vrot.slane %v16_v18, %v75_v24 }
   0x9   :  { %v92_v37 = vrot.slane %v16_v18, %v91_v31  ;;  %v108_v46 = vrot.slane %v16_v18, %v107_v38  ;;  %v124_v52 = vrot.slane %v16_v18, %v123_v40  ;;  %v140_v53 = vrot.slane %v16_v18, %v139_v41 }
   0xa   :  { %v147_v61 = vand.u32 15, %v146_v50 }
   0xb   :  { %219 = vset.pattern.permute.xlu0 %v235_v4  ;;  %218 = vset.pattern.permute.xlu1 %v235_v4 }
   0xc   :  { %50 = vperm.xlu0 %219, %v14_v2   ;;  %54 = vperm.xlu1 %218, %v15_v1   ;;  %vm148_vm0 = vcmp.ne.s32.totalorder %v147_v61, 15 }
  0x10   :  { %220 = vset.pattern.permute.xlu1 %v236_v5  ;;  %221 = vset.pattern.permute.xlu0 %v237_v6 }
  0x11   :  { %70 = vperm.xlu1 %220, %v15_v1   ;;  %86 = vperm.xlu0 %221, %v15_v1  }
  0x15   :  { %66 = vperm.xlu1 %220, %v14_v2   ;;  %224 = vset.pattern.permute.xlu0 %v238_v7 }
  0x16   :  { %98 = vperm.xlu0 %224, %v14_v2  }
  0x19   :  { %222 = vset.pattern.permute.xlu1 %v237_v6 }
  0x1a   :  { %82 = vperm.xlu1 %222, %v14_v2   ;;  %226 = vset.pattern.permute.xlu0 %v239_v8 }
  0x1b   :  { %134 = vperm.xlu0 %226, %v15_v1  }
  0x1e   :  { %223 = vset.pattern.permute.xlu1 %v238_v7 }
  0x1f   :  { %102 = vperm.xlu1 %223, %v15_v1   ;;  %230 = vset.pattern.permute.xlu0 %v234_v3 }
  0x23   :  { %225 = vset.pattern.permute.xlu1 %v240_v9 }
  0x24   :  { %118 = vperm.xlu1 %225, %v15_v1  }
  0x28   :  { %114 = vperm.xlu1 %225, %v14_v2  }
  0x2c   :  { %227 = vset.pattern.permute.xlu1 %v239_v8 }
  0x2d   :  { %130 = vperm.xlu1 %227, %v14_v2  }
  0x31   :  { %228 = vset.pattern.permute.xlu1 %v233_v0 }
  0x81   :  { %v20_v10 = vpop.permute.xlu1 %19  ;;  %v25_v13 = vpop.permute.xlu0 %24 }
  0x82   :  { %v32_v25 = vmul.f32 %v30_v22, %v25_v13  ;;  %v31_v48 = vmul.f32 %v30_v22, %v20_v10 }
  0x86   :  { %v35_v12 = vpop.permute.xlu1 %34  ;;  %v39_v19 = vpop.permute.xlu0 %38 }
  0x87   :  { %v46_v26 = vmul.f32 %v44_v23, %v39_v19  ;;  %v45_v42 = vmul.f32 %v44_v23, %v35_v12 }
  0x89   :  { %v48_v32 = vadd.f32 %v46_v26, %v32_v25  ;;  %v47_v54 = vadd.f32 %v45_v42, %v31_v48 }
  0x8b   :  { %v55_v15 = vpop.permute.xlu1 %54  ;;  %v51_v29 = vpop.permute.xlu0 %50 }
  0x8c   :  { %v62_v33 = vmul.f32 %v60_v27, %v55_v15  ;;  %v61_v49 = vmul.f32 %v60_v27, %v51_v29 }
  0x8e   :  { %v64_v39 = vadd.f32 %v62_v33, %v48_v32  ;;  %v63_v58 = vadd.f32 %v61_v49, %v47_v54  ;;  %v173_v33 = vld [vmem:[%s292_s2] sm:$0xff] }
  0x90   :  { %v71_v21 = vpop.permute.xlu1 %70  ;;  %v87_v34 = vpop.permute.xlu0 %86 }
  0x91   :  { %v78_v36 = vmul.f32 %v76_v30, %v71_v21  ;;  %v94_v45 = vmul.f32 %v92_v37, %v87_v34 }
  0x93   :  { %v80_v44 = vadd.f32 %v78_v36, %v64_v39 }
  0x94   :  { %v67_v28 = vpop.permute.xlu1 %66 }
  0x95   :  { %v99_v43 = vpop.permute.xlu0 %98  ;;  %v77_v55 = vmul.f32 %v76_v30, %v67_v28  ;;  %v96_v57 = vadd.f32 %v94_v45, %v80_v44 }
  0x96   :  { %v109_v5 = vmul.f32 %v108_v46, %v99_v43 }
  0x97   :  { %v79_v1 = vadd.f32 %v77_v55, %v63_v58 }
  0x99   :  { %v83_v35 = vpop.permute.xlu1 %82 }
  0x9a   :  { %v135_v56 = vpop.permute.xlu0 %134  ;;  %v93_v59 = vmul.f32 %v92_v37, %v83_v35 }
  0x9b   :  { %v142_v0 = vmul.f32 %v140_v53, %v135_v56 }
  0x9c   :  { %v95_v4 = vadd.f32 %v93_v59, %v79_v1 }
  0x9e   :  { %v103_v47 = vpop.permute.xlu1 %102  ;;  %v111_v10 = vadd.f32 %v109_v5, %v95_v4 }
  0x9f   :  { %v110_v51 = vmul.f32 %v108_v46, %v103_v47 }
  0xa1   :  { %v112_v62 = vadd.f32 %v110_v51, %v96_v57 }
  0xa3   :  { %v119_v60 = vpop.permute.xlu1 %118 }
  0xa4   :  { %v126_v63 = vmul.f32 %v124_v52, %v119_v60 }
  0xa6   :  { %v128_v2 = vadd.f32 %v126_v63, %v112_v62 }
  0xa7   :  { %v115_v6 = vpop.permute.xlu1 %114 }
  0xa8   :  { %v144_v7 = vadd.f32 %v142_v0, %v128_v2  ;;  %v125_v8 = vmul.f32 %v124_v52, %v115_v6 }
  0xaa   :  { %v149_v9 = vsel %vm148_vm0, %v144_v7, 0.0  ;;  %v127_v13 = vadd.f32 %v125_v8, %v111_v10 }
  0xab   :  { %v154_v11 = vsel %vm150_vm1, %v149_v9, 0.0  ;;  %v162_v18 = vmul.f32 %v149_v9, %v149_v9 }
  0xac   :  { %v131_v12 = vpop.permute.xlu1 %130  ;;  %155 = vadd.xlane.f32.xlu0 %v154_v11 }
  0xad   :  { %v141_v14 = vmul.f32 %v140_v53, %v131_v12  ;;  %v163_v20 = vsel %vm150_vm1, %v162_v18, 0.0 }
  0xaf   :  { %v143_v15 = vadd.f32 %v141_v14, %v127_v13 }
  0xb1   :  { %v151_v16 = vsel %vm150_vm1, %v143_v15, 0.0  ;;  %v158_v17 = vmul.f32 %v143_v15, %v143_v15 }
  0xb2   :  { %152 = vadd.xlane.f32.xlu1 %v151_v16 }
  0xb3   :  { %v159_v19 = vsel %vm150_vm1, %v158_v17, 0.0 }
  0xb4   :  { %160 = vadd.xlane.f32.xlu0 %v159_v19 }
  0xb6   :  { %164 = vadd.xlane.f32.xlu1 %v163_v20 }
 0x139   :  { %v156_v21 = vpop.xlane.xlu0 %155 }
 0x13f   :  { %v153_v22 = vpop.xlane.xlu1 %152 }
 0x140   :  { %v157_v23 = vadd.f32 %v156_v21, %v153_v22 }
 0x141   :  { %v161_v25 = vpop.xlane.xlu0 %160 }
 0x142   :  { %v168_v24 = vmul.f32 0.016129032, %v157_v23 }
 0x143   :  { %v165_v26 = vpop.xlane.xlu1 %164 }
 0x144   :  { %v166_v27 = vadd.f32 %v165_v26, %v161_v25  ;;  %v170_v28 = vmul.f32 %v168_v24, %v168_v24 }
 0x146   :  { %v169_v29 = vmul.f32 0.016129032, %v166_v27 }
 0x148   :  { %v171_v30 = vsub.f32 %v169_v29, %v170_v28 }
 0x14a   :  { %v172_v31 = vmax.f32 %v171_v30, 0.0 }
 0x14c   :  { %v174_v32 = vadd.f32 1e-05, %v172_v31 }
 0x14e   :  { %231 = vrsqrt.f32 %v174_v32 }
 0x158   :  { %v232_v34 = vpop.eup %231 }
 0x159   :  { %v176_v35 = vmul.f32 %v232_v34, %v173_v33 }
 0x15b   :  { %185 = vperm.xlu1 %228, %v176_v35   ;;  %v177_v36 = vmul.f32 %v176_v35, %v168_v24 }
 0x15d   :  { %179 = vrot.lane.b32.xlu0 %v177_v36, %s241_s18 }
 0x15f   :  { %229 = vset.pattern.permute.xlu1 %v234_v3 }
 0x1cf   :  { %v180_v37 = vpop.permute.xlu0 %179 }
 0x1d0   :  { %v182_v38 = vsub.f32 %v173_v33, %v180_v37 }
 0x1d2   :  { %191 = vperm.xlu1 %229, %v182_v38  }
 0x1da   :  { %v186_v39 = vpop.permute.xlu1 %185 }
 0x1db   :  { %v188_v40 = vmul.f32 %v186_v39, %v143_v15  ;;  %v196_v41 = vmul.f32 %v186_v39, %v149_v9 }
 0x251   :  { %v192_v42 = vpop.permute.xlu1 %191 }
 0x252   :  { %v194_v43 = vadd.f32 %v192_v42, %v188_v40  ;;  %v197_v44 = vadd.f32 %v196_v41, %v192_v42 }
 0x254   :  { %195 = vst.msk [vmem:[%s293_s3] sm:$0xff] %vm150_vm1, %v194_v43  ;;  %204 = vst.msk [vmem:[%s293_s3 + $0x8] sm:$0xff] %vm150_vm1, %v197_v44 }

</bundles_post_ra>
